<compile_context>
chip_gen: v7x
topology: tpu7x:2x2x1
jax: 0.10.0
libtpu: 0.0.40
codegen_flags: <defaults>
</compile_context>

<pallas_src>
import functools

import jax
import jax.numpy as jnp
from jax.experimental import pallas as pl
from jax.experimental.pallas import tpu as pltpu


def _cdiv(a, b):
    return -(-a // b)


def _round_up(x, m):
    return ((x + m - 1) // m) * m


def _vmem_capacity_bytes():
    try:
        info = pltpu.get_tpu_info()
        cap = getattr(info, "vmem_capacity_bytes", None)
        if cap:
            return int(cap)
    except Exception:
        pass
    return 64 * 1024 * 1024  # conservative (v7x per-TC)


def _num_tensorcores():
    try:
        info = pltpu.get_tpu_info()
        for name in ("num_cores", "num_tensorcores", "tensorcores_per_chip",
                     "core_count"):
            v = getattr(info, name, None)
            if v:
                return int(v)
    except Exception:
        pass
    # Conservative default: assume megacore so we always balance (the extra
    # grid step is ~0.35 us on a single-TC chip — negligible).
    return 2


def _attn_kernel(g_ref, x_ref, wg_ref, wx_ref, b1_ref, wpsi_ref, bpsi_ref,
                 out_ref, *, precision):
    """One (batch, spatial-tile) grid step.

    g_ref: (F_g, TL)  x_ref/out_ref: (F_l, TL)  -- spatial on lanes.
    wg_ref: (F_int, F_g)  wx_ref: (F_int, F_l)   (I/O dtype; f32 accumulation)
    b1_ref: (F_int, 1) = folded (bg + bx)  f32    wpsi_ref: (F_int, 1) f32
    bpsi_ref: (1,) f32 scalar in SMEM.

    INVARIANT: no reductions across the lane (spatial) axis — the last spatial
    tile may carry unspecified data in its pad lanes (stores are masked).
    """
    x = x_ref[...]
    # 1x1 convs as channel matmuls on the MXU, f32 accumulation.
    a = (jnp.dot(wg_ref[...], g_ref[...],
                 preferred_element_type=jnp.float32, precision=precision)
         + jnp.dot(wx_ref[...], x,
                   preferred_element_type=jnp.float32, precision=precision)
         + b1_ref[...])
    a = jnp.maximum(a, 0.0)                                      # ReLU (VPU)
    # psi conv has a single output channel -> sublane (channel) reduce (XLU).
    z = jnp.sum(a * wpsi_ref[...], axis=0, keepdims=True) + bpsi_ref[0]
    psi = jax.nn.sigmoid(z)                                      # f32, EUP exp
    # Gate: cast the 1xTL psi row to the I/O dtype (not the F_l x TL x tile).
    out_ref[...] = (x * psi.astype(x.dtype)).astype(out_ref.dtype)


def _fold_bn(w, b, gamma, beta, mean, var, eps=1e-5):
    """Fold eval-mode BatchNorm into a 1x1 conv. w: (Cout, Cin), b: (Cout,)."""
    scale = gamma / jnp.sqrt(var + eps)
    return w * scale[:, None], (b - mean) * scale + beta


def attention_block(g, x, params, *, max_tile_l=4096, vmem_budget_bytes=None):
    """g: (B, F_g, H, W), x: (B, F_l, H, W)  (NCHW, like PyTorch)."""
    B, F_g, H, W = g.shape
    Bx, F_l, Hx, Wx = x.shape
    assert (B, H, W) == (Bx, Hx, Wx)
    F_int = params["wg"].shape[0]
    HW = H * W

    io_dtype = x.dtype
    if g.dtype != io_dtype:
        g = g.astype(io_dtype)
    itemsize = jnp.dtype(io_dtype).itemsize

    # Fold BN (eval-mode running stats) into the conv weights/biases (f32).
    wg, bg = _fold_bn(params["wg"], params["bg"], params["bn_g_gamma"],
                      params["bn_g_beta"], params["bn_g_mean"], params["bn_g_var"])
    wx, bx = _fold_bn(params["wx"], params["bx"], params["bn_x_gamma"],
                      params["bn_x_beta"], params["bn_x_mean"], params["bn_x_var"])
    wpsi, bpsi = _fold_bn(params["wpsi"], params["bpsi"], params["bn_p_gamma"],
                          params["bn_p_beta"], params["bn_p_mean"], params["bn_p_var"])

    # bf16 I/O path keeps weights in bf16 (f32 accumulation on the MXU);
    # f32 path keeps f32 weights and uses HIGHEST matmul precision (free —
    # MXU has large slack at the HBM roofline).
    if io_dtype == jnp.bfloat16:
        weight_dtype = jnp.bfloat16
        precision = jax.lax.Precision.DEFAULT
    else:
        weight_dtype = jnp.float32
        precision = jax.lax.Precision.HIGHEST

    wg_io = wg.astype(weight_dtype)                        # (F_int, F_g)
    wx_io = wx.astype(weight_dtype)                        # (F_int, F_l)
    b1 = (bg + bx).astype(jnp.float32).reshape(F_int, 1)   # pre-summed bias
    wpsi_col = wpsi.astype(jnp.float32).reshape(F_int, 1)
    bpsi1 = bpsi.astype(jnp.float32).reshape(1)

    # --- generation-aware VMEM budgeting ----------------------------------
    vmem_cap = _vmem_capacity_bytes()
    if vmem_budget_bytes is None:
        vmem_budget_bytes = (24 << 20) if vmem_cap <= (64 << 20) else (48 << 20)
    vmem_limit_cap = (44 << 20) if vmem_cap <= (64 << 20) else (96 << 20)

    # Per spatial column: double-buffered streamed tiles (g, x in; out) plus
    # the single-buffered f32 compute residents (intermediate `a`, psi row,
    # gating temporary).
    stream_bytes_per_col = 2 * (F_g + 2 * F_l) * itemsize
    live_bytes_per_col = (F_int + F_l + 2) * 4
    bytes_per_col = stream_bytes_per_col + live_bytes_per_col
    # TODO(synk): for very large F_int (>=128) chunk the lane axis inside the
    # kernel (unrolled fori_loop) so `a` stays in vregs instead of VMEM.

    # --- spatial tile selection: big, multiple of 128, VMEM-budgeted -------
    hw128 = _round_up(HW, 128)
    budget_tl = max(128, (vmem_budget_bytes // bytes_per_col) // 128 * 128)
    tile_l = min(hw128, max_tile_l, budget_tl)
    if tile_l >= HW:
        tile_l = HW                      # single full block, no masked lanes
    n_tiles = _cdiv(HW, tile_l)

    # Megacore balance: make the total grid-step count split evenly across
    # TensorCores (v7x) when the grid is small; cheap on single-TC chips.
    num_tc = _num_tensorcores()
    if num_tc >= 2:
        for _ in range(4):
            total = B * n_tiles
            if total % num_tc == 0 or total >= 8 * num_tc:
                break
            new_tile = _round_up(_cdiv(tile_l, 2), 128)
            if new_tile >= tile_l:
                break
            tile_l = new_tile
            n_tiles = _cdiv(HW, tile_l)

    # NCHW with spatial flattened onto lanes (free reshape, no transposes,
    # no padding/slicing HBM passes).
    g3 = g.reshape(B, F_g, HW)
    x3 = x.reshape(B, F_l, HW)

    grid = (B, n_tiles)
    row = lambda C: pl.BlockSpec((None, C, tile_l), lambda b, j: (b, 0, j))
    full = lambda shape: pl.BlockSpec(shape, lambda b, j: (0, 0))

    vmem_limit = int(min(vmem_limit_cap,
                         max(32 << 20, bytes_per_col * tile_l + (8 << 20))))
    weight_bytes = (jnp.dtype(weight_dtype).itemsize * F_int * (F_g + F_l)
                    + 4 * (2 * F_int + 1))
    cost = pl.CostEstimate(
        flops=int(2 * B * HW * F_int * (F_g + F_l)
                  + B * HW * (3 * F_int + F_l + 2)),
        transcendentals=int(B * HW),
        bytes_accessed=int(itemsize * B * HW * (F_g + 2 * F_l) + weight_bytes),
    )

    out3 = pl.pallas_call(
        functools.partial(_attn_kernel, precision=precision),
        out_shape=jax.ShapeDtypeStruct((B, F_l, HW), io_dtype),
        grid_spec=pltpu.PrefetchScalarGridSpec(
            num_scalar_prefetch=0,
            grid=grid,
            in_specs=[
                row(F_g),                                    # g tile
                row(F_l),                                    # x tile
                full((F_int, F_g)),                          # wg (BN folded)
                full((F_int, F_l)),                          # wx (BN folded)
                full((F_int, 1)),                            # bg + bx
                full((F_int, 1)),                            # wpsi (as column)
                pl.BlockSpec(memory_space=pltpu.MemorySpace.SMEM),  # bpsi
            ],
            out_specs=pl.BlockSpec((None, F_l, tile_l), lambda b, j: (b, 0, j)),
        ),
        compiler_params=pltpu.CompilerParams(
            dimension_semantics=("parallel", "parallel"),
            vmem_limit_bytes=vmem_limit),
        cost_estimate=cost,
    )(g3, x3, wg_io, wx_io, b1, wpsi_col, bpsi1)

    return out3.reshape(B, F_l, H, W)


def init_params(key, F_g, F_l, F_int):
    ks = jax.random.split(key, 6)
    return {
        # 1x1 conv weights stored as (Cout, Cin); PyTorch is (Cout, Cin, 1, 1).
        "wg": jax.random.normal(ks[0], (F_int, F_g), jnp.float32) * 0.1,
        "bg": jax.random.normal(ks[1], (F_int,), jnp.float32) * 0.1,
        "wx": jax.random.normal(ks[2], (F_int, F_l), jnp.float32) * 0.1,
        "bx": jax.random.normal(ks[3], (F_int,), jnp.float32) * 0.1,
        "wpsi": jax.random.normal(ks[4], (1, F_int), jnp.float32) * 0.1,
        "bpsi": jax.random.normal(ks[5], (1,), jnp.float32) * 0.1,
        # BatchNorm params at PyTorch defaults (eval-mode semantics).
        "bn_g_gamma": jnp.ones((F_int,), jnp.float32),
        "bn_g_beta": jnp.zeros((F_int,), jnp.float32),
        "bn_g_mean": jnp.zeros((F_int,), jnp.float32),
        "bn_g_var": jnp.ones((F_int,), jnp.float32),
        "bn_x_gamma": jnp.ones((F_int,), jnp.float32),
        "bn_x_beta": jnp.zeros((F_int,), jnp.float32),
        "bn_x_mean": jnp.zeros((F_int,), jnp.float32),
        "bn_x_var": jnp.ones((F_int,), jnp.float32),
        "bn_p_gamma": jnp.ones((1,), jnp.float32),
        "bn_p_beta": jnp.zeros((1,), jnp.float32),
        "bn_p_mean": jnp.zeros((1,), jnp.float32),
        "bn_p_var": jnp.ones((1,), jnp.float32),
    }


def _reference(g, x, params):
    """Pure-JAX NCHW reference of the same (BN-folded, eval-mode) forward."""
    wg, bg = _fold_bn(params["wg"], params["bg"], params["bn_g_gamma"],
                      params["bn_g_beta"], params["bn_g_mean"], params["bn_g_var"])
    wx, bx = _fold_bn(params["wx"], params["bx"], params["bn_x_gamma"],
                      params["bn_x_beta"], params["bn_x_mean"], params["bn_x_var"])
    wpsi, bpsi = _fold_bn(params["wpsi"], params["bpsi"], params["bn_p_gamma"],
                          params["bn_p_beta"], params["bn_p_mean"], params["bn_p_var"])
    hp = jax.lax.Precision.HIGHEST
    g1 = jnp.einsum("oi,bihw->bohw", wg, g, precision=hp) + bg[None, :, None, None]
    x1 = jnp.einsum("oi,bihw->bohw", wx, x, precision=hp) + bx[None, :, None, None]
    a = jnp.maximum(g1 + x1, 0.0)
    psi = jax.nn.sigmoid(jnp.einsum("oi,bihw->bohw", wpsi, a, precision=hp)
                         + bpsi[None, :, None, None])
    return x * psi


if __name__ == "__main__":
    # TODO(synk): BatchNorm is implemented in eval mode (running stats);
    # PyTorch default train-mode batch statistics are not reproduced.
    key = jax.random.PRNGKey(0)
    k1, k2, k3, k4, k5, k6 = jax.random.split(key, 6)

    # Case 1: f32, spatial a multiple of 128 (no partial tiles).
    B, F_g, F_l, F_int, H, W = 2, 4, 4, 8, 16, 16
    g = jax.random.normal(k1, (B, F_g, H, W), jnp.float32)
    x = jax.random.normal(k2, (B, F_l, H, W), jnp.float32)
    params = init_params(k3, F_g, F_l, F_int)
    out = jax.block_until_ready(attention_block(g, x, params))
    ref = _reference(g, x, params)
    assert out.shape == (B, F_l, H, W)
    assert jnp.allclose(out, ref, atol=2e-3, rtol=2e-3), float(
        jnp.max(jnp.abs(out - ref)))

    # Case 2: f32, ragged spatial size (exercises the no-pad partial-block
    # path: masked stores on the last tile, no extra pad/slice HBM passes).
    B2, Fg2, Fl2, Fi2, H2, W2 = 1, 6, 5, 12, 13, 11
    g2 = jax.random.normal(k4, (B2, Fg2, H2, W2), jnp.float32)
    x2 = jax.random.normal(k5, (B2, Fl2, H2, W2), jnp.float32)
    params2 = init_params(k6, Fg2, Fl2, Fi2)
    out2 = jax.block_until_ready(attention_block(g2, x2, params2))
    ref2 = _reference(g2, x2, params2)
    assert out2.shape == (B2, Fl2, H2, W2)
    assert jnp.allclose(out2, ref2, atol=2e-3, rtol=2e-3), float(
        jnp.max(jnp.abs(out2 - ref2)))

    # Case 3: bf16 I/O path (halved HBM traffic; f32 accumulation).
    gb = g.astype(jnp.bfloat16)
    xb = x.astype(jnp.bfloat16)
    outb = jax.block_until_ready(attention_block(gb, xb, params))
    refb = _reference(gb.astype(jnp.float32), xb.astype(jnp.float32), params)
    assert outb.dtype == jnp.bfloat16 and outb.shape == (B, F_l, H, W)
    assert jnp.allclose(outb.astype(jnp.float32), refb, atol=1e-1, rtol=1e-1), \
        float(jnp.max(jnp.abs(outb.astype(jnp.float32) - refb)))

    print("KERNEL_OK")
</pallas_src>

<mosaic_0001>
module attributes {stable_mosaic.version = 11 : i64} {
  func.func @_attn_kernel(%arg0: i32, %arg1: i32, %arg2: memref<1x4x256xf32, #tpu.memory_space<vmem>>, %arg3: memref<1x4x256xf32, #tpu.memory_space<vmem>>, %arg4: memref<8x4xf32, #tpu.memory_space<vmem>>, %arg5: memref<8x4xf32, #tpu.memory_space<vmem>>, %arg6: memref<8x1xf32, #tpu.memory_space<vmem>>, %arg7: memref<8x1xf32, #tpu.memory_space<vmem>>, %arg8: memref<1xf32, #tpu.memory_space<smem>>, %arg9: memref<1x4x256xf32, #tpu.memory_space<vmem>>) attributes {dimension_semantics = [#tpu.dimension_semantics<parallel>, #tpu.dimension_semantics<parallel>], iteration_bounds = array<i64: 2, 1>, scalar_prefetch = 0 : i64, scratch_operands = 0 : i64, tpu.core_type = #tpu.core_type<tc>, window_params = [{transform_indices = @transform_0, window_bounds = array<i64: 1, 4, 256>}, {transform_indices = @transform_1, window_bounds = array<i64: 1, 4, 256>}, {pipeline_mode = #tpu.pipeline_mode<synchronous>, transform_indices = @transform_2, window_bounds = array<i64: 8, 4>}, {pipeline_mode = #tpu.pipeline_mode<synchronous>, transform_indices = @transform_3, window_bounds = array<i64: 8, 4>}, {pipeline_mode = #tpu.pipeline_mode<synchronous>, transform_indices = @transform_4, window_bounds = array<i64: 8, 1>}, {pipeline_mode = #tpu.pipeline_mode<synchronous>, transform_indices = @transform_5, window_bounds = array<i64: 8, 1>}, {transform_indices = @transform_6, window_bounds = array<i64: 1>}, {transform_indices = @transform_7, window_bounds = array<i64: 1, 4, 256>}]} {
    %c0 = arith.constant 0 : index
    %c0_0 = arith.constant 0 : index
    %c0_1 = arith.constant 0 : index
    %0 = vector.load %arg3[%c0, %c0_0, %c0_1] : memref<1x4x256xf32, #tpu.memory_space<vmem>>, vector<1x4x256xf32>
    %1 = vector.shape_cast %0 : vector<1x4x256xf32> to vector<4x256xf32>
    %c0_2 = arith.constant 0 : index
    %c0_3 = arith.constant 0 : index
    %2 = vector.load %arg4[%c0_2, %c0_3] : memref<8x4xf32, #tpu.memory_space<vmem>>, vector<8x4xf32>
    %c0_4 = arith.constant 0 : index
    %c0_5 = arith.constant 0 : index
    %c0_6 = arith.constant 0 : index
    %3 = vector.load %arg2[%c0_4, %c0_5, %c0_6] : memref<1x4x256xf32, #tpu.memory_space<vmem>>, vector<1x4x256xf32>
    %4 = vector.shape_cast %3 : vector<1x4x256xf32> to vector<4x256xf32>
    %cst = arith.constant dense<0.000000e+00> : vector<8x256xf32>
    %5 = tpu.matmul %2, %4, %cst {dimension_numbers = #tpu.dot_dimension_numbers<[1], [0], [0], [1], [0, 0, 1, 1], [], []>, precision = #tpu.contract_precision<fp32>} : vector<8x4xf32>, vector<4x256xf32>, vector<8x256xf32> -> vector<8x256xf32>
    %c0_7 = arith.constant 0 : index
    %c0_8 = arith.constant 0 : index
    %6 = vector.load %arg5[%c0_7, %c0_8] : memref<8x4xf32, #tpu.memory_space<vmem>>, vector<8x4xf32>
    %cst_9 = arith.constant dense<0.000000e+00> : vector<8x256xf32>
    %7 = tpu.matmul %6, %1, %cst_9 {dimension_numbers = #tpu.dot_dimension_numbers<[1], [0], [0], [1], [0, 0, 1, 1], [], []>, precision = #tpu.contract_precision<fp32>} : vector<8x4xf32>, vector<4x256xf32>, vector<8x256xf32> -> vector<8x256xf32>
    %8 = arith.addf %5, %7 : vector<8x256xf32>
    %c0_10 = arith.constant 0 : index
    %c0_11 = arith.constant 0 : index
    %9 = vector.load %arg6[%c0_10, %c0_11] : memref<8x1xf32, #tpu.memory_space<vmem>>, vector<8x1xf32>
    %10 = vector.broadcast %9 : vector<8x1xf32> to vector<8x256xf32>
    %11 = arith.addf %8, %10 : vector<8x256xf32>
    %cst_12 = arith.constant 0.000000e+00 : f32
    %12 = vector.broadcast %cst_12 : f32 to vector<8x256xf32>
    %13 = arith.maximumf %11, %12 : vector<8x256xf32>
    %c0_13 = arith.constant 0 : index
    %c0_14 = arith.constant 0 : index
    %14 = vector.load %arg7[%c0_13, %c0_14] : memref<8x1xf32, #tpu.memory_space<vmem>>, vector<8x1xf32>
    %15 = vector.broadcast %14 : vector<8x1xf32> to vector<8x256xf32>
    %16 = arith.mulf %13, %15 : vector<8x256xf32>
    %cst_15 = arith.constant dense<0.000000e+00> : vector<256xf32>
    %17 = vector.multi_reduction <add>, %16, %cst_15 [0] : vector<8x256xf32> to vector<256xf32>
    %18 = vector.shape_cast %17 : vector<256xf32> to vector<1x256xf32>
    %c0_16 = arith.constant 0 : index
    %19 = memref.load %arg8[%c0_16] : memref<1xf32, #tpu.memory_space<smem>>
    %20 = vector.broadcast %19 : f32 to vector<1x256xf32>
    %21 = arith.addf %18, %20 : vector<1x256xf32>
    %22 = arith.negf %21 : vector<1x256xf32>
    %23 = math.exp %22 : vector<1x256xf32>
    %cst_17 = arith.constant 1.000000e+00 : f32
    %24 = vector.broadcast %cst_17 : f32 to vector<1x256xf32>
    %25 = arith.addf %24, %23 : vector<1x256xf32>
    %26 = arith.divf %24, %25 : vector<1x256xf32>
    %27 = vector.broadcast %26 : vector<1x256xf32> to vector<4x256xf32>
    %28 = arith.mulf %1, %27 : vector<4x256xf32>
    %c0_18 = arith.constant 0 : index
    %c0_19 = arith.constant 0 : index
    %c0_20 = arith.constant 0 : index
    %29 = vector.load %arg9[%c0_18, %c0_19, %c0_20] : memref<1x4x256xf32, #tpu.memory_space<vmem>>, vector<1x4x256xf32>
    %30 = vector.shape_cast %29 : vector<1x4x256xf32> to vector<4x256xf32>
    %31 = vector.shape_cast %28 : vector<4x256xf32> to vector<1x4x256xf32>
    tpu.vector_store %arg9[%c0_18, %c0_19, %c0_20], %31 {strides = array<i32>} : memref<1x4x256xf32, #tpu.memory_space<vmem>>, vector<1x4x256xf32>,
    return
  }
  func.func @transform_0(%arg0: i32, %arg1: i32) -> (i32, i32, i32) {
    %c0_i32 = arith.constant 0 : i32
    %c0_i32_0 = arith.constant 0 : i32
    return %arg0, %c0_i32, %arg1 : i32, i32, i32
  }
  func.func @transform_1(%arg0: i32, %arg1: i32) -> (i32, i32, i32) {
    %c0_i32 = arith.constant 0 : i32
    %c0_i32_0 = arith.constant 0 : i32
    return %arg0, %c0_i32, %arg1 : i32, i32, i32
  }
  func.func @transform_2(%arg0: i32, %arg1: i32) -> (i32, i32) {
    %c0_i32 = arith.constant 0 : i32
    %c0_i32_0 = arith.constant 0 : i32
    %c0_i32_1 = arith.constant 0 : i32
    return %c0_i32, %c0_i32_0 : i32, i32
  }
  func.func @transform_3(%arg0: i32, %arg1: i32) -> (i32, i32) {
    %c0_i32 = arith.constant 0 : i32
    %c0_i32_0 = arith.constant 0 : i32
    %c0_i32_1 = arith.constant 0 : i32
    return %c0_i32, %c0_i32_0 : i32, i32
  }
  func.func @transform_4(%arg0: i32, %arg1: i32) -> (i32, i32) {
    %c0_i32 = arith.constant 0 : i32
    %c0_i32_0 = arith.constant 0 : i32
    %c0_i32_1 = arith.constant 0 : i32
    return %c0_i32, %c0_i32_0 : i32, i32
  }
  func.func @transform_5(%arg0: i32, %arg1: i32) -> (i32, i32) {
    %c0_i32 = arith.constant 0 : i32
    %c0_i32_0 = arith.constant 0 : i32
    %c0_i32_1 = arith.constant 0 : i32
    return %c0_i32, %c0_i32_0 : i32, i32
  }
  func.func @transform_6(%arg0: i32, %arg1: i32) -> i32 {
    %c0_i32 = arith.constant 0 : i32
    %c0_i32_0 = arith.constant 0 : i32
    return %c0_i32 : i32
  }
  func.func @transform_7(%arg0: i32, %arg1: i32) -> (i32, i32, i32) {
    %c0_i32 = arith.constant 0 : i32
    %c0_i32_0 = arith.constant 0 : i32
    return %arg0, %c0_i32, %arg1 : i32, i32, i32
  }
}

</mosaic_0001>

<bundles_post_ra>
// kernel: tpu_custom_call.1
= control target key start
LH: loop header
LB: loop body
LE: loop exit
PB: predicated region body
PF: predicated region fallthrough
CT: control target
= control target key end

     0   :  { %s1881_s0 = inlined_call_operand.vmem [shape: f32[2,4,256], index: 0, kind: input, shape index: {}]   ;;  %s1882_s1 = inlined_call_operand.vmem [shape: f32[2,4,256], index: 1, kind: input, shape index: {}]   ;;  %s1883_s2 = inlined_call_operand.vmem [shape: f32[8,4], index: 2, kind: input, shape index: {}]   ;;  %s1884_s3 = inlined_call_operand.vmem [shape: f32[8,4], index: 3, kind: input, shape index: {}]   ;;  %s1885_s4 = inlined_call_operand.vmem [shape: f32[8,1], index: 4, kind: input, shape index: {}]   ;;  %s1886_s5 = inlined_call_operand.vmem [shape: f32[8,1], index: 5, kind: input, shape index: {}]   ;;  %s1887_s6 = inlined_call_operand.<no memory space> [shape: f32[1], index: 6, kind: input, shape index: {}]   ;;  %s1888_s7 = inlined_call_operand.hbm [shape: f32[2,4,256], index: 7, kind: output, shape index: {}]  }
   0x1   :  { %12 = sst [smem:[#allocation2]] %s1887_s6 }
   0x2   :  { %13 = vsyncpa [#allocation4], 0 }
   0x3   :  { %15 = vsyncpa [#allocation4 + $0x1], 0  ;;  %s1698_s26 = smov 0   ;;  %s1700_s27 = smov 0  }
   0x4   :  { %s1702_s28 = smov 0   ;;  %s1704_s29 = smov 0  }
   0x5   :  { %s1706_s30 = smov 0   ;;  %s1708_s8 = smov 0  }
   0x6 LB: > { %s1462_s6 = sadd.s32 4294967295, %s1650_s8   ;;  %s1463_s9 = sadd.s32 4294967294, %s1650_s8   ;;  %s1650_s8 = sphi %s1708_s8, %s21_s8   ;;  %s1646_s30 = sphi %s1706_s30, %s1895_s30   ;;  %s1642_s29 = sphi %s1704_s29, %s1894_s29   ;;  %s1638_s28 = sphi %s1702_s28, %s1893_s28   ;;  %s1634_s27 = sphi %s1700_s27, %s1892_s27   ;;  %s1630_s26 = sphi %s1698_s26, %s1891_s26  }
   0x7   : > { %s33_s10 = sadd.s32 1, %s1646_s30  ;;  %s203_s11 = sadd.s32 1, %s1638_s28 }
   0x8   : > { %p35_p0 = scmp.ge.s32.totalorder %s33_s10, 2  ;;  %p213_p1 = scmp.ne.s32.totalorder %s1638_s28, %s1634_s27 }
   0x9   : > { %p214_p2 = scmp.eq.s32.totalorder %s1462_s6, 1  ;;  %p219_p3 = scmp.ne.s32.totalorder %s1634_s27, %s1630_s26 }
   0xa   : > { %s1897_s10 = smov (%p35_p0, %s33_s10), 0  ;;  %p220_p5 = scmp.eq.s32.totalorder %s1463_s9, 1 }
   0xb   : > { %p1738_p4 = por %p214_p2, %p213_p1  ;;  %s198_s13 = ssub.s32 %s1646_s30, %s1897_s10 }
   0xc   : > { %p1466_p6 = scmp.ge.s32.totalorder %s1650_s8, 1  ;;  %p201_p7 = scmp.eq.s32.totalorder %s198_s13, 0 }
   0xd   : > { %p1745_p8 = por %p220_p5, %p219_p3  ;;  %p279_p9 = scmp.lt.s32.totalorder %s1650_s8, 3 }
   0xe   : > { %s1751_s15 = scalar_select %p201_p7, %s1638_s28, %s203_s11  }
   0xf   : > { %p280_p10 = pnand %p1466_p6, %p279_p9 }
  0x10   : > { %p325_p11 = scmp.lt.s32.totalorder (!%p280_p10), %s1642_s29, 1  ;;  %v348_v0 = vld [vmem:[%s1884_s3] sm:$0xff] (!%p280_p10)  ;;  %vm351_vm0 = vcmask (!%p280_p10), 31744   ;;  %v1652_v2 = vmov (!%p280_p10), 0.0   ;;  %v1653_v8 = vmov (!%p280_p10), 0   ;;  %vm355_vm1 = vcmask (!%p280_p10), 1043456  }
  0x11   : > { %283 = sbr.rel (%p280_p10) target bundleno = 356 (0x164), region = 48  ;;  %v346_v1 = vld [vmem:[%s1883_s2] sm:$0xff] (!%p280_p10)  ;;  %426 = vmatprep.mubr.f32.mxu1 (!%p280_p10), %v1652_v2  ;;  %900 = vmatprep.mubr.f32.mxu0 (!%p280_p10), %v1652_v2  ;;  %v353_v3 = vsel (!%p280_p10), %vm351_vm0, %v348_v0, 0  ;;  %s1329_s18 = sld [smem:[#allocation2]] (!%p280_p10) }
  0x12   : > { %v828_v4 = vsel (!%p280_p10), %vm351_vm0, %v346_v1, 0  ;;  %v1299_v5 = vld [vmem:[%s1885_s4] sm:$0xff] (!%p280_p10)  ;;  %v1766_v6 = vand.u32 (!%p280_p10), 4294901760, %v353_v3  ;;  %1561 = vset.pattern.permute.xlu0 (!%p280_p10), %v1653_v8  ;;  %s321_s19 = sand.u32 (!%p280_p10), 1, %s1634_s27   ;;  %s1481_s21 = sshll.u32 (!%p280_p10), %s1642_s29, 7 }
  0x13   : > { %v1768_v7 = vand.u32 (!%p280_p10), 4294901760, %v828_v4  ;;  %1302 = vperm.xlu0 (!%p280_p10), %1561, %v1299_v5   ;;  %v1309_v11 = vld [vmem:[%s1886_s5] sm:$0xff] (!%p280_p10)  ;;  %s1467_s20 = sshll.u32 (!%p280_p10), %s321_s19, 3  ;;  %s1834_s6 = scalar_lea.hbm (!%p280_p10), %s1888_s7, %s1481_s21 }
  0x14   : > { %v1771_v9 = vsub.f32 (!%p280_p10), %v353_v3, %v1766_v6  ;;  %s1352_s9 = scalar_lea.sflag (!%p280_p10), [#allocation4], %s321_s19 }
  0x15   : > { %v1774_v10 = vsub.f32 (!%p280_p10), %v828_v4, %v1768_v7 }
  0x16   : > { %v429_v14 = vand.u32 (!%p280_p10), 4294901760, %v1771_v9 }
  0x17   : > { %v903_v15 = vand.u32 (!%p280_p10), 4294901760, %v1774_v10  ;;  %1312 = vperm.xlu0 (!%p280_p10), %1561, %v1309_v11   ;;  %v1330_v5 = vstv (!%p280_p10), %s1329_s18 }
  0x18   : > { %s326_s22 = scalar_select %p325_p11, %s1642_s29, 1  ;;  %v430_v22 = vsub.f32 %v1771_v9, %v429_v14 }
  0x19   : > { %v904_v23 = vsub.f32 %v1774_v10, %v903_v15  ;;  %s1654_s29 = smov [#allocation3]  }
  0x1a   : > { %s1479_s23 = sshll.u32 %s326_s22, 3  ;;  %v431_v30 = vand.u32 4294901760, %v430_v22  ;;  %s323_s22 = scalar_lea.vmem [#allocation3], %s1467_s20 }
  0x1b   : > { %s342_s11 = scalar_lea.vmem %s1882_s1, %s1479_s23  ;;  %s332_s17 = scalar_lea.vmem %s1881_s0, %s1479_s23  ;;  %v905_v31 = vand.u32 4294901760, %v904_v23 }
  0x1c   : > { %v1785_v12 = vld [vmem:[%s342_s11] sm:$0xff]  ;;  %s1368_s23 = sshll.u32 %s323_s22, 4  ;;  %s1576_s13 = sshll.u32 %s1654_s29, 4  ;;  %s1836_s23 = int_to_ptr.vmem [resolvable:$true] %s1368_s23  ;;  %s1577_s13 = int_to_ptr.vmem [resolvable:$false] %s1576_s13 }
  0x1d   : > { %v347_v13 = vld [vmem:[%s332_s17] sm:$0xff]  ;;  %v350_v16 = vcombine.high %v1785_v12, %v1785_v12  ;;  %v356_v18 = vsel %vm355_vm1, %v1785_v12, 0  ;;  %s1572_s11 = scalar_lea.vmem %s1836_s23, 128  ;;  %s1578_s16 = scalar_lea.vmem %s1577_s13, 256 }
  0x1e   : > { %v826_v17 = vcombine.high %v347_v13, %v347_v13  ;;  %v830_v19 = vsel %vm355_vm1, %v347_v13, 0  ;;  %v1794_v20 = vand.u32 4294901760, %v356_v18  ;;  %p1573_p12 = scmp.ne.s32.totalorder %s1836_s23, %s1572_s11  ;;  %p1579_p1 = scmp.lt.s32.totalorder %s1836_s23, %s1577_s13 }
  0x1f   : > { %v1796_v21 = vand.u32 4294901760, %v830_v19  ;;  %v358_v24 = vsel %vm355_vm1, %v350_v16, 0  ;;  %p1580_p2 = scmp.lt.s32.totalorder %s1578_s16, %s1572_s11 }
  0x20   : > { %v832_v25 = vsel %vm355_vm1, %v826_v17, 0  ;;  %v360_v26 = vand.u32 4294901760, %v358_v24  ;;  %v445_v28 = vsub.f32 %v356_v18, %v1794_v20  ;;  %p1574_p13 = pnand %p1573_p12, %p1738_p4 }
  0x21   : > { %v834_v27 = vand.u32 4294901760, %v832_v25  ;;  %v919_v29 = vsub.f32 %v830_v19, %v1796_v21  ;;  %p1581_p3 = por %p1580_p2, %p1579_p1 }
  0x22   : > { %361 = vmatprep.subr.mxu1 %v360_v26  ;;  %v439_v32 = vsub.f32 %v358_v24, %v360_v26  ;;  %v446_v34 = vand.u32 4294901760, %v445_v28  ;;  %p1575_p0 = pneg %p1574_p13 }
  0x23   : > { %835 = vmatprep.subr.mxu0 %v834_v27  ;;  %v913_v33 = vsub.f32 %v832_v25, %v834_v27  ;;  %v920_v35 = vand.u32 4294901760, %v919_v29  ;;  %363 = vmatpush1.msra.mxu1 %v1794_v20 }
  0x24   : > { %837 = vmatpush1.msra.mxu0 %v1796_v21  ;;  %432 = vmatmul.mubr.f32.vlgmr.msra.gmra.mrb[0].mxu1 %v431_v30  ;;  %v440_v36 = vand.u32 4294901760, %v439_v32  ;;  %v447_v38 = vsub.f32 %v445_v28, %v446_v34  ;;  %p1582_p5 = pnand %p1581_p3, %p1575_p0 }
  0x25   : > { %906 = vmatmul.mubr.f32.vlgmr.msra.gmra.mrb[0].mxu0 %v905_v31  ;;  %v914_v37 = vand.u32 4294901760, %v913_v33  ;;  %v921_v39 = vsub.f32 %v919_v29, %v920_v35  ;;  %512 = vmatprep.mubr.f32.mxu1 %v1652_v2 }
  0x26   : > { %986 = vmatprep.mubr.f32.mxu0 %v1652_v2  ;;  %v441_v40 = vsub.f32 %v439_v32, %v440_v36  ;;  %v448_v42 = vand.u32 4294901760, %v447_v38 }
  0x27   : > { %v915_v41 = vsub.f32 %v913_v33, %v914_v37  ;;  %v922_v43 = vand.u32 4294901760, %v921_v39 }
  0x28   : > { %v442_v44 = vand.u32 4294901760, %v441_v40 }
  0x29   : > { %v916_v45 = vand.u32 4294901760, %v915_v41 }
  0x2a   : > { %443 = vmatprep.subr.mxu1 %v442_v44 }
  0x2b   : > { %917 = vmatprep.subr.mxu0 %v916_v45  ;;  %449 = vmatpush1.msra.mxu1 %v448_v42 }
  0x2c   : > { %923 = vmatpush1.msra.mxu0 %v922_v43  ;;  %514 = vmatmul.mubr.f32.vlgmr.msra.gmra.mrb[0].mxu1 %v1766_v6 }
  0x2d   : > { %988 = vmatmul.mubr.f32.vlgmr.msra.gmra.mrb[0].mxu0 %v1768_v7  ;;  %522 = vmatprep.subr.mxu1 %v439_v32 }
  0x2e   : > { %996 = vmatprep.subr.mxu0 %v913_v33  ;;  %525 = vmatpush1.msra.mxu1 %v445_v28 }
  0x2f   : > { %588 = vmatprep.mubr.f32.mxu1 %v1652_v2  ;;  %999 = vmatpush1.msra.mxu0 %v919_v29 }
  0x30   : > { %1062 = vmatprep.mubr.f32.mxu0 %v1652_v2  ;;  %598 = vmatprep.subr.mxu1 %v360_v26 }
  0x31   : > { %1072 = vmatprep.subr.mxu0 %v834_v27 }
  0x34   : > { %591 = vmatmul.mubr.f32.vlgmr.msra.gmra.mrb[0].mxu1 %v1771_v9 }
  0x35   : > { %1065 = vmatmul.mubr.f32.vlgmr.msra.gmra.mrb[0].mxu0 %v1774_v10  ;;  %600 = vmatpush1.msra.mxu1 %v1794_v20 }
  0x36   : > { %663 = vmatprep.mubr.f32.mxu1 %v1652_v2  ;;  %1074 = vmatpush1.msra.mxu0 %v1796_v21 }
  0x37   : > { %1137 = vmatprep.mubr.f32.mxu0 %v1652_v2  ;;  %676 = vmatprep.subr.mxu1 %v440_v36 }
  0x38   : > { %1150 = vmatprep.subr.mxu0 %v914_v37 }
  0x3c   : > { %667 = vmatmul.mubr.f32.vlgmr.msra.gmra.mrb[0].mxu1 %v429_v14 }
  0x3d   : > { %1141 = vmatmul.mubr.f32.vlgmr.msra.gmra.mrb[0].mxu0 %v903_v15  ;;  %680 = vmatpush1.msra.mxu1 %v446_v34 }
  0x3e   : > { %743 = vmatprep.mubr.f32.mxu1 %v1652_v2  ;;  %1154 = vmatpush1.msra.mxu0 %v920_v35 }
  0x3f   : > { %1217 = vmatprep.mubr.f32.mxu0 %v1652_v2  ;;  %752 = vmatprep.subr.mxu1 %v360_v26 }
  0x40   : > { %1226 = vmatprep.subr.mxu0 %v834_v27 }
  0x44   : > { %745 = vmatmul.mubr.f32.vlgmr.msra.gmra.mrb[0].mxu1 %v1766_v6 }
  0x45   : > { %1219 = vmatmul.mubr.f32.vlgmr.msra.gmra.mrb[0].mxu0 %v1768_v7  ;;  %754 = vmatpush1.msra.mxu1 %v1794_v20 }
  0x46   : > { %817 = vmatprep.mubr.f32.mxu1 %v1652_v2  ;;  %1228 = vmatpush1.msra.mxu0 %v1796_v21 }
  0x47   : > { %1291 = vmatprep.mubr.f32.mxu0 %v1652_v2 }
  0x4c   : > { %819 = vmatmul.mubr.f32.vlgmr.msra.gmra.mrb[0].mxu1 %v1766_v6 }
  0x4d   : > { %1293 = vmatmul.mubr.f32.vlgmr.msra.gmra.mrb[0].mxu0 %v1768_v7 }
  0x92   : > { %v1303_v46 = vpop.permute.xlu0 %1302 }
  0x96   : > { %v1313_v57 = vpop.permute.xlu0 %1312 }
 0x11f   : > { %v820_v47 = vpop.f32.mrb[0].mxu1 }
 0x120   : > { %v1294_v48 = vpop.f32.mrb[0].mxu0  ;;  %v822_v50 = vpop.f32.mrb[1].mxu1 }
 0x121   : > { %v1482_v49 = vadd.f32 %v1294_v48, %v820_v47  ;;  %v1296_v51 = vpop.f32.mrb[1].mxu0 }
 0x122   : > { %v1483_v52 = vadd.f32 %v1296_v51, %v822_v50 }
 0x123   : > { %v1305_v53 = vadd.f32 %v1482_v49, %v1303_v46 }
 0x124   : > { %v1306_v54 = vadd.f32 %v1483_v52, %v1303_v46 }
 0x125   : > { %v1307_v55 = vmax.f32 %v1305_v53, 0.0 }
 0x126   : > { %v1308_v56 = vmax.f32 %v1306_v54, 0.0 }
 0x127   : > { %v1315_v58 = vmul.f32 %v1313_v57, %v1307_v55 }
 0x128   : > { %v1316_v59 = vmul.f32 %v1313_v57, %v1308_v56 }
 0x129   : > { %v1317_v60 = vrot.slane %v1315_v58, 4 }
 0x12a   : > { %v1323_v61 = vrot.slane %v1316_v59, 4 }
 0x12b   : > { %v1318_v62 = vadd.f32 %v1317_v60, %v1315_v58 }
 0x12c   : > { %v1324_v63 = vadd.f32 %v1323_v61, %v1316_v59 }
 0x12d   : > { %v1319_v0 = vrot.slane %v1318_v62, 2 }
 0x12e   : > { %v1325_v1 = vrot.slane %v1324_v63, 2 }
 0x12f   : > { %v1320_v2 = vadd.f32 %v1319_v0, %v1318_v62 }
 0x130   : > { %v1326_v3 = vadd.f32 %v1325_v1, %v1324_v63 }
 0x131   : > { %v1321_v4 = vrot.slane %v1320_v2, 1 }
 0x132   : > { %v1327_v6 = vrot.slane %v1326_v3, 1 }
 0x133   : > { %v1322_v7 = vadd.f32 %v1321_v4, %v1320_v2 }
 0x134   : > { %v1328_v8 = vadd.f32 %v1327_v6, %v1326_v3 }
 0x135   : > { %v1331_v9 = vadd.f32 %v1330_v5, %v1322_v7 }
 0x136   : > { %v1332_v10 = vadd.f32 %v1330_v5, %v1328_v8 }
 0x137   : > { %v1472_v11 = vmul.f32 -1.442695, %v1331_v9 }
 0x138   : > { %v1473_v13 = vmul.f32 -1.442695, %v1332_v10 }
 0x139   : > { %1564 = vpow2.f32 %v1472_v11 }
 0x13a   : > { %1566 = vpow2.f32 %v1473_v13 }
 0x143   : > { %v1565_v14 = vpop.eup %1564 }
 0x144   : > { %v1567_v15 = vpop.eup %1566  ;;  %v1339_v16 = vadd.f32 1.0, %v1565_v14 }
 0x145   : > { %v1340_v17 = vadd.f32 1.0, %v1567_v15 }
 0x146   : > { %1568 = vrcp.f32 %v1339_v16 }
 0x147   : > { %1570 = vrcp.f32 %v1340_v17 }
 0x150   : > { %v1569_v18 = vpop.eup %1568 }
 0x151   : > { %v1571_v19 = vpop.eup %1570 }
 0x152   : > { %v1347_v20 = vcombine.low %v1569_v18, %v1571_v19 }
 0x154   : > { %v1349_v21 = vmul.f32 %v1347_v20, %v1785_v12 }
 0x156   : > { %1350 = vst [vmem:[%s323_s22] sm:$0xff] %v1349_v21 }
 0x157   : > { %1585 = shalt.err (!%p1582_p5)
}
 0x158   : > { %s1586_s17 = scalar_lea.hbm %s1834_s6, 128  ;;  %s1590_s20 = scalar_lea.hbm %s1888_s7, 256 }
 0x159   : > { %p1587_p6 = scmp.ne.s32.totalorder %s1834_s6, %s1586_s17  ;;  %p1591_p10 = scmp.lt.u32.totalorder %s1834_s6, %s1888_s7 }
 0x15a   : > { %p1592_p11 = scmp.lt.u32.totalorder %s1590_s20, %s1586_s17  ;;  %p1594_p13 = scmp.lt.u32.totalorder %s1586_s17, %s1834_s6 }
 0x15b   : > { %p1588_p7 = pnand %p1587_p6, %p1738_p4 }
 0x15c   : > { %p1593_p12 = por %p1592_p11, %p1591_p10 }
 0x15d   : > { %p1589_p9 = pneg %p1588_p7 }
 0x15e   : > { %p1595_p0 = por %p1594_p13, %p1593_p12 }
 0x160   : > { %p1596_p1 = pnand %p1595_p0, %p1589_p9 }
 0x162   : > { %1599 = shalt.err (!%p1596_p1)
}
 0x163   : > { %1504 = dma.vmem_to_hbm [thread:$0]  (%p1738_p4), %s1836_s23, 128, %s1834_s6, %s1352_s9  }
 0x164 PF: > { %p1510_p2 = scmp.ge.s32.totalorder %s1650_s8, 2  ;;  %s1380_s24 = sand.u32 1, %s1630_s26  }
 0x165   : > { %s1381_s25 = scalar_lea.sflag [#allocation4], %s1380_s24 }
 0x166   : > { %p1507_p3 = pnand %p1510_p2, %p1745_p8 }
 0x168   : > { %1625 = dma.done.wait (!%p1507_p3), %s1381_s25, 128  }
 0x169   : > { %1627 = vsyncadd (!%p1507_p3), %s1381_s25, 4294967168  ;;  %s21_s8 = sadd.s32 1, %s1650_s8   ;;  %s1891_s26 = smov %s1634_s27 }
 0x16a   : > { %p18_p5 = scmp.ge.s32.totalorder %s21_s8, 4   ;;  %s1892_s27 = smov %s1638_s28 }
 0x16b   : > { %s1893_s28 = smov %s1751_s15  ;;  %s1894_s29 = smov %s1646_s30 }
 0x16c   : > { %s1895_s30 = smov %s1897_s10  ;;  %20 = sbr.rel (!%p18_p5) target bundleno = 6 (0x6), region = 86 }
 0x173   :  { %1386 = vsyncpa [#allocation4], 1 }
 0x174   :  { %1388 = vsyncpa [#allocation4 + $0x1], 1 }

</bundles_post_ra>
